<compile_context>
chip_gen: v5e
topology: v5e:2x2
jax: 0.10.0
libtpu: 0.0.40
codegen_flags: <defaults>
</compile_context>

<pallas_src>
from functools import partial

import jax
import jax.numpy as jnp
from jax.experimental import pallas as pl
from jax.experimental.pallas import tpu as pltpu


def autopad(k, p=None, d=1):
    if d > 1:
        k = d * (k - 1) + 1 if isinstance(k, int) else [d * (x - 1) + 1 for x in k]
    if p is None:
        p = k // 2 if isinstance(k, int) else [x // 2 for x in k]
    return p


def _round_up(x, m):
    return (x + m - 1) // m * m


def _norm_act(acc, g_ref, b_ref, *, c2, c2p, eps, norm, relu):
    """LayerNorm over the true C2 channels (+affine) and ReLU on f32 (rows, C2p).

    Padded lanes [c2, c2p) of acc are exactly zero (zero weight columns); they
    are masked out of the statistics and end up exactly zero in the output
    (gamma/beta are zero-padded), so chained layers can keep the padded layout.
    """
    y = acc
    if norm:
        inv_n = jnp.float32(1.0 / c2)
        mean = jnp.sum(acc, axis=-1, keepdims=True) * inv_n
        d = acc - mean
        if c2p != c2:
            lane = jax.lax.broadcasted_iota(jnp.int32, acc.shape, acc.ndim - 1)
            d = jnp.where(lane < c2, d, 0.0)
        var = jnp.sum(d * d, axis=-1, keepdims=True) * inv_n
        y = d * jax.lax.rsqrt(var + eps)
        y = y * g_ref[...].astype(jnp.float32) + b_ref[...].astype(jnp.float32)
    if relu:
        y = jnp.maximum(y, 0.0)
    return y


def _pointwise_kernel(x_ref, w_ref, g_ref, b_ref, o_ref, *, c2, c2p, eps, norm, relu):
    # x_ref: (tm, C1)  w_ref: (C1, C2p)  g/b: (1, C2p)  o_ref: (tm, C2p)
    acc = jnp.dot(x_ref[...], w_ref[...], preferred_element_type=jnp.float32)
    o_ref[...] = _norm_act(acc, g_ref, b_ref, c2=c2, c2p=c2p, eps=eps,
                           norm=norm, relu=relu).astype(o_ref.dtype)


def _conv_kernel(x_ref, w_ref, g_ref, b_ref, o_ref, xpad_ref, *,
                 k, p, q, L, Lt, c2, c2p, eps, norm, relu):
    # x_ref: (1, L, C1)  w_ref: (k*C1, C2p)  g/b: (1, C2p)  o_ref: (1, Lt, C2p)
    # xpad_ref: (rows, C1) VMEM scratch holding the zero-padded sequence.
    # Refilled every grid step (cheap, ~L*C1 elements, VMEM->VMEM) so it is
    # correct no matter how the ("parallel","parallel") grid is split per core.
    xpad_ref[...] = jnp.zeros_like(xpad_ref)
    xpad_ref[pl.ds(q, L), :] = x_ref[0]

    lo = pl.multiple_of(pl.program_id(1) * Lt, Lt)        # first output row of this tile
    # im2col LHS: tap j contributes x_pad[lo + r + j - p, :] for r in [0, Lt)
    taps = [xpad_ref[pl.ds(lo + (q - p + j), Lt), :] for j in range(k)]
    lhs = jnp.concatenate(taps, axis=-1)                  # (Lt, k*C1): one MXU contraction
    acc = jnp.dot(lhs, w_ref[...], preferred_element_type=jnp.float32)
    o_ref[0] = _norm_act(acc, g_ref, b_ref, c2=c2, c2p=c2p, eps=eps,
                         norm=norm, relu=relu).astype(o_ref.dtype)


def conv1d_block(x, w, gamma=None, beta=None, *, norm=True, act=True, eps=1e-5,
                 tile_m=1024, tile_l=128, keep_padded_channels=False):
    """Fused Conv1d(bias=False) [+ LayerNorm(C2)] [+ ReLU].

    x:          (B, L, C1x) channels-last.  C1x may exceed the weight's C1 — the
                extra trailing channels are treated as zero-weight padding so
                chained blocks can carry a lane-dense 128-padded channel layout.
    w:          (C2, C1, k) nn.Conv1d weight layout; odd k, s=1, g=1, d=1.
    gamma/beta: (C2,) LayerNorm affine (required when norm=True).
    Returns (B, L, C2), or (B, L, C2p) with C2p = round_up(C2, 128) when
    keep_padded_channels=True (padded channels are exactly zero).
    """
    B, L, C1x = x.shape
    C2, C1w, k = w.shape
    assert k % 2 == 1, "only odd kernel sizes are supported (module uses 1..11)"
    assert C1x >= C1w
    relu = bool(act)

    # Lane-dense output channels; zero-pad weight input channels up to x's width.
    C2p = _round_up(C2, 128)
    w_p = jnp.pad(w, ((0, C2p - C2), (0, C1x - C1w), (0, 0)))
    if norm:
        g_p = jnp.pad(gamma, (0, C2p - C2)).reshape(1, C2p)
        b_p = jnp.pad(beta, (0, C2p - C2)).reshape(1, C2p)
    else:
        g_p = jnp.zeros((1, C2p), x.dtype)
        b_p = jnp.zeros((1, C2p), x.dtype)

    if k == 1:
        # Pointwise conv: fuse (B, L) -> M, no input padding (ragged last block
        # handled by Pallas with clipped stores), big M tiles.
        M = B * L
        x2 = x.reshape(M, C1x)                            # free reshape, no HBM copy
        tm = min(tile_m, _round_up(M, 8))
        w2 = jnp.transpose(w_p[:, :, 0], (1, 0))          # (C1x, C2p)

        out = pl.pallas_call(
            partial(_pointwise_kernel, c2=C2, c2p=C2p, eps=eps, norm=norm, relu=relu),
            out_shape=jax.ShapeDtypeStruct((M, C2p), x.dtype),
            grid_spec=pltpu.PrefetchScalarGridSpec(
                num_scalar_prefetch=0,
                grid=(pl.cdiv(M, tm),),
                in_specs=[
                    pl.BlockSpec((tm, C1x), lambda i: (i, 0)),
                    pl.BlockSpec((C1x, C2p), lambda i: (0, 0)),    # resident weights
                    pl.BlockSpec((1, C2p), lambda i: (0, 0)),
                    pl.BlockSpec((1, C2p), lambda i: (0, 0)),
                ],
                out_specs=pl.BlockSpec((tm, C2p), lambda i: (i, 0)),
            ),
            compiler_params=pltpu.CompilerParams(
                dimension_semantics=("parallel",)),
        )(x2, w2, g_p, b_p)
        out = out.reshape(B, L, C2p)
        return out if keep_padded_channels else out[..., :C2]

    # Odd k > 1: grid over (batch, L-tiles); per-batch sequence stays resident in
    # VMEM, taps folded into one K = k*C1 contraction, bounded f32 accumulator.
    p = autopad(k)
    Lt = min(tile_l, _round_up(L, 8))
    n_lt = pl.cdiv(L, Lt)
    q = _round_up(p, 8)                                   # aligned start of x inside scratch
    rows = _round_up(q + n_lt * Lt + p, 8)                # covers ragged-last-tile tap reads
    w2 = jnp.transpose(w_p, (2, 1, 0)).reshape(k * C1x, C2p)   # w2[j*C1+c1, c2] = W[c2,c1,j]

    out = pl.pallas_call(
        partial(_conv_kernel, k=k, p=p, q=q, L=L, Lt=Lt, c2=C2, c2p=C2p,
                eps=eps, norm=norm, relu=relu),
        out_shape=jax.ShapeDtypeStruct((B, L, C2p), x.dtype),
        grid_spec=pltpu.PrefetchScalarGridSpec(
            num_scalar_prefetch=0,
            grid=(B, n_lt),
            in_specs=[
                pl.BlockSpec((1, L, C1x), lambda b, m: (b, 0, 0)),       # full seq per batch
                pl.BlockSpec((k * C1x, C2p), lambda b, m: (0, 0)),       # resident weights
                pl.BlockSpec((1, C2p), lambda b, m: (0, 0)),
                pl.BlockSpec((1, C2p), lambda b, m: (0, 0)),
            ],
            out_specs=pl.BlockSpec((1, Lt, C2p), lambda b, m: (b, m, 0)),
            scratch_shapes=[pltpu.VMEM((rows, C1x), x.dtype)],
        ),
        compiler_params=pltpu.CompilerParams(
            dimension_semantics=("parallel", "parallel")),
    )(x, w2, g_p, b_p)
    return out if keep_padded_channels else out[..., :C2]


def _reference(x, w, gamma=None, beta=None, *, k, norm=True, eps=1e-5):
    """Pure-JAX reference mirroring the PyTorch Conv1d module forward (f32)."""
    p = autopad(k)
    xt = jnp.transpose(x, (0, 2, 1))                      # (B, C1, L) == x.permute(0,2,1)
    y = jax.lax.conv_general_dilated(
        xt, w, window_strides=(1,), padding=[(p, p)],
        dimension_numbers=("NCH", "OIH", "NCH"))
    y = jnp.transpose(y, (0, 2, 1))                       # (B, L, C2)
    if norm:
        mean = y.mean(-1, keepdims=True)
        var = ((y - mean) ** 2).mean(-1, keepdims=True)
        y = (y - mean) / jnp.sqrt(var + eps) * gamma + beta
    return jnp.maximum(y, 0.0)


if __name__ == "__main__":
    key = jax.random.PRNGKey(0)
    B, L, C1, C2 = 2, 16, 8, 32
    kx, kw1, kw7, kw9, kw11, kg, kb, kg2, kb2 = jax.random.split(key, 9)

    x = jax.random.normal(kx, (B, L, C1), jnp.float32)
    g1 = 1.0 + 0.1 * jax.random.normal(kg, (C2,), jnp.float32)
    b1 = 0.1 * jax.random.normal(kb, (C2,), jnp.float32)

    checks = []

    # 1) f32: k=1 (class default, fused-M pointwise path) and k=7 (Tran_block use).
    for k, kw in ((1, kw1), (7, kw7)):
        w = 0.2 * jax.random.normal(kw, (C2, C1, k), jnp.float32)
        out = jax.block_until_ready(conv1d_block(x, w, g1, b1))
        ref = _reference(x, w, g1, b1, k=k)
        checks.append(bool(jnp.allclose(out, ref, atol=1e-4, rtol=1e-4)))

    # 2) Chained conv_feat-style pair (k=7 then k=9) keeping the 128-padded
    #    channel layout between layers (pad/slice once per network).
    C2b = 16
    w7 = 0.2 * jax.random.normal(kw7, (C2, C1, 7), jnp.float32)
    w9 = 0.2 * jax.random.normal(kw9, (C2b, C2, 9), jnp.float32)
    g2 = 1.0 + 0.1 * jax.random.normal(kg2, (C2b,), jnp.float32)
    b2 = 0.1 * jax.random.normal(kb2, (C2b,), jnp.float32)
    h_pad = conv1d_block(x, w7, g1, b1, keep_padded_channels=True)   # (B, L, 128)
    out2 = jax.block_until_ready(conv1d_block(h_pad, w9, g2, b2))
    ref2 = _reference(_reference(x, w7, g1, b1, k=7), w9, g2, b2, k=9)
    checks.append(bool(jnp.allclose(out2, ref2, atol=1e-3, rtol=1e-3)))

    # 3) Final conv of conv_feat: k=11, C2=1, norm=False, act=ReLU.
    w11 = 0.2 * jax.random.normal(kw11, (1, C1, 11), jnp.float32)
    out3 = jax.block_until_ready(conv1d_block(x, w11, norm=False))
    ref3 = _reference(x, w11, k=11, norm=False)
    checks.append(bool(jnp.allclose(out3, ref3, atol=1e-4, rtol=1e-4)))

    # 4) bf16 path: native MXU input dtype, f32 accumulation inside the kernel.
    w1 = 0.2 * jax.random.normal(kw1, (C2, C1, 1), jnp.float32)
    out_bf = jax.block_until_ready(
        conv1d_block(x.astype(jnp.bfloat16), w1.astype(jnp.bfloat16),
                     g1.astype(jnp.bfloat16), b1.astype(jnp.bfloat16)))
    ref_bf = _reference(x, w1, g1, b1, k=1)
    checks.append(bool(jnp.allclose(out_bf.astype(jnp.float32), ref_bf,
                                    atol=1e-1, rtol=1e-1)))

    if all(checks):
        print("KERNEL_OK")
    else:
        print("KERNEL_MISMATCH", checks)
</pallas_src>

<mosaic_0001>
module attributes {stable_mosaic.version = 11 : i64} {
  func.func @_pointwise_kernel(%arg0: i32, %arg1: memref<32x8xf32, #tpu.memory_space<vmem>>, %arg2: memref<8x128xf32, #tpu.memory_space<vmem>>, %arg3: memref<1x128xf32, #tpu.memory_space<vmem>>, %arg4: memref<1x128xf32, #tpu.memory_space<vmem>>, %arg5: memref<32x128xf32, #tpu.memory_space<vmem>>) attributes {dimension_semantics = [#tpu.dimension_semantics<parallel>], iteration_bounds = array<i64: 1>, scalar_prefetch = 0 : i64, scratch_operands = 0 : i64, tpu.core_type = #tpu.core_type<tc>, window_params = [{transform_indices = @transform_0, window_bounds = array<i64: 32, 8>}, {pipeline_mode = #tpu.pipeline_mode<synchronous>, transform_indices = @transform_1, window_bounds = array<i64: 8, 128>}, {pipeline_mode = #tpu.pipeline_mode<synchronous>, transform_indices = @transform_2, window_bounds = array<i64: 1, 128>}, {pipeline_mode = #tpu.pipeline_mode<synchronous>, transform_indices = @transform_3, window_bounds = array<i64: 1, 128>}, {transform_indices = @transform_4, window_bounds = array<i64: 32, 128>}]} {
    %c0 = arith.constant 0 : index
    %c0_0 = arith.constant 0 : index
    %0 = vector.load %arg1[%c0, %c0_0] : memref<32x8xf32, #tpu.memory_space<vmem>>, vector<32x8xf32>
    %c0_1 = arith.constant 0 : index
    %c0_2 = arith.constant 0 : index
    %1 = vector.load %arg2[%c0_1, %c0_2] : memref<8x128xf32, #tpu.memory_space<vmem>>, vector<8x128xf32>
    %cst = arith.constant dense<0.000000e+00> : vector<32x128xf32>
    %2 = tpu.matmul %0, %1, %cst {dimension_numbers = #tpu.dot_dimension_numbers<[1], [0], [0], [1], [0, 0, 1, 1], [], []>} : vector<32x8xf32>, vector<8x128xf32>, vector<32x128xf32> -> vector<32x128xf32>
    %cst_3 = arith.constant dense<0.000000e+00> : vector<32xf32>
    %3 = vector.multi_reduction <add>, %2, %cst_3 [1] : vector<32x128xf32> to vector<32xf32>
    %4 = vector.shape_cast %3 : vector<32xf32> to vector<32x1xf32>
    %cst_4 = arith.constant 3.125000e-02 : f32
    %5 = vector.broadcast %cst_4 : f32 to vector<32x1xf32>
    %6 = arith.mulf %4, %5 : vector<32x1xf32>
    %7 = vector.broadcast %6 : vector<32x1xf32> to vector<32x128xf32>
    %8 = arith.subf %2, %7 : vector<32x128xf32>
    %9 = tpu.iota {dimensions = array<i32: 1>} : vector<32x128xi32>
    %c32_i32 = arith.constant 32 : i32
    %10 = vector.broadcast %c32_i32 : i32 to vector<32x128xi32>
    %11 = arith.cmpi slt, %9, %10 : vector<32x128xi32>
    %cst_5 = arith.constant 0.000000e+00 : f32
    %12 = vector.broadcast %cst_5 : f32 to vector<32x128xf32>
    %13 = arith.select %11, %8, %12 : vector<32x128xi1>, vector<32x128xf32>
    %14 = arith.mulf %13, %13 : vector<32x128xf32>
    %cst_6 = arith.constant dense<0.000000e+00> : vector<32xf32>
    %15 = vector.multi_reduction <add>, %14, %cst_6 [1] : vector<32x128xf32> to vector<32xf32>
    %16 = vector.shape_cast %15 : vector<32xf32> to vector<32x1xf32>
    %cst_7 = arith.constant 3.125000e-02 : f32
    %17 = vector.broadcast %cst_7 : f32 to vector<32x1xf32>
    %18 = arith.mulf %16, %17 : vector<32x1xf32>
    %cst_8 = arith.constant 9.99999974E-6 : f32
    %19 = vector.broadcast %cst_8 : f32 to vector<32x1xf32>
    %20 = arith.addf %18, %19 : vector<32x1xf32>
    %21 = math.rsqrt %20 : vector<32x1xf32>
    %22 = vector.broadcast %21 : vector<32x1xf32> to vector<32x128xf32>
    %23 = arith.mulf %13, %22 : vector<32x128xf32>
    %c0_9 = arith.constant 0 : index
    %c0_10 = arith.constant 0 : index
    %24 = vector.load %arg3[%c0_9, %c0_10] : memref<1x128xf32, #tpu.memory_space<vmem>>, vector<1x128xf32>
    %25 = vector.broadcast %24 : vector<1x128xf32> to vector<32x128xf32>
    %26 = arith.mulf %23, %25 : vector<32x128xf32>
    %c0_11 = arith.constant 0 : index
    %c0_12 = arith.constant 0 : index
    %27 = vector.load %arg4[%c0_11, %c0_12] : memref<1x128xf32, #tpu.memory_space<vmem>>, vector<1x128xf32>
    %28 = vector.broadcast %27 : vector<1x128xf32> to vector<32x128xf32>
    %29 = arith.addf %26, %28 : vector<32x128xf32>
    %cst_13 = arith.constant 0.000000e+00 : f32
    %30 = vector.broadcast %cst_13 : f32 to vector<32x128xf32>
    %31 = arith.maximumf %29, %30 : vector<32x128xf32>
    %c0_14 = arith.constant 0 : index
    %c0_15 = arith.constant 0 : index
    %32 = vector.load %arg5[%c0_14, %c0_15] : memref<32x128xf32, #tpu.memory_space<vmem>>, vector<32x128xf32>
    tpu.vector_store %arg5[%c0_14, %c0_15], %31 {strides = array<i32>} : memref<32x128xf32, #tpu.memory_space<vmem>>, vector<32x128xf32>,
    return
  }
  func.func @transform_0(%arg0: i32) -> (i32, i32) {
    %c0_i32 = arith.constant 0 : i32
    %c0_i32_0 = arith.constant 0 : i32
    return %arg0, %c0_i32 : i32, i32
  }
  func.func @transform_1(%arg0: i32) -> (i32, i32) {
    %c0_i32 = arith.constant 0 : i32
    %c0_i32_0 = arith.constant 0 : i32
    %c0_i32_1 = arith.constant 0 : i32
    return %c0_i32, %c0_i32_0 : i32, i32
  }
  func.func @transform_2(%arg0: i32) -> (i32, i32) {
    %c0_i32 = arith.constant 0 : i32
    %c0_i32_0 = arith.constant 0 : i32
    %c0_i32_1 = arith.constant 0 : i32
    return %c0_i32, %c0_i32_0 : i32, i32
  }
  func.func @transform_3(%arg0: i32) -> (i32, i32) {
    %c0_i32 = arith.constant 0 : i32
    %c0_i32_0 = arith.constant 0 : i32
    %c0_i32_1 = arith.constant 0 : i32
    return %c0_i32, %c0_i32_0 : i32, i32
  }
  func.func @transform_4(%arg0: i32) -> (i32, i32) {
    %c0_i32 = arith.constant 0 : i32
    %c0_i32_0 = arith.constant 0 : i32
    return %arg0, %c0_i32 : i32, i32
  }
}

</mosaic_0001>

<bundles_post_ra>
// kernel: tpu_custom_call.1
= control target key start
LH: loop header
LB: loop body
LE: loop exit
PB: predicated region body
PF: predicated region fallthrough
CT: control target
= control target key end

     0   :  { %vm23_vm0 = vcmask 64512   ;;  %s311_s0 = inlined_call_operand.vmem [shape: f32[32,8], index: 0, kind: input, shape index: {}]   ;;  %s312_s1 = inlined_call_operand.vmem [shape: f32[8,128], index: 1, kind: input, shape index: {}]   ;;  %s313_s2 = inlined_call_operand.vmem [shape: f32[1,128], index: 2, kind: input, shape index: {}]   ;;  %s314_s3 = inlined_call_operand.vmem [shape: f32[1,128], index: 3, kind: input, shape index: {}]   ;;  %s315_s4 = inlined_call_operand.hbm [shape: f32[32,128], index: 4, kind: output, shape index: {}]  }
   0x1   :  { %v22_v0 = vld [vmem:[%s312_s1] sm:$0xff]  ;;  %v20_v2 = vld [vmem:[%s311_s0 + $0x10] sm:$0xff]  ;;  %v19_v3 = vld [vmem:[%s311_s0 + $0x8] sm:$0xff] }
   0x2   :  { %v18_v1 = vld [vmem:[%s311_s0] sm:$0xff]  ;;  %51 = vmatpush.msra.mxu0 %v22_v0  ;;  %199 = vmatpush.msra.mxu2 %v22_v0  ;;  %v21_v4 = vld [vmem:[%s311_s0 + $0x18] sm:$0xff] }
   0x3   :  { %194 = vmatmul.msk.f32.vlgmr.msra.gmra.mxu0 %vm23_vm0, %v18_v1  ;;  %196 = vmatmul.msk.f32.vlgmr.msra.gmra.mxu2 %vm23_vm0, %v20_v2 }
   0x4   :  { %9 = vsyncpa [#allocation3], 0  ;;  %198 = vmatpush.msra.mxu1 %v22_v0  ;;  %200 = vmatpush.msra.mxu3 %v22_v0  ;;  %v81_v9 = vlaneseq  ;;  %v204_v54 = vld [vmem:[%s313_s2] ss:$0 sm:$0xff]  ;;  %s240_s2 = smov [#allocation2]   ;;  %s182_s29 = sshll.u32 %s315_s4, 4  ;;  %s183_s29 = int_to_ptr.hbm [resolvable:$true] %s182_s29 }
   0x5   :  { %195 = vmatmul.msk.f32.vlgmr.msra.gmra.mxu1 %vm23_vm0, %v19_v3  ;;  %197 = vmatmul.msk.f32.vlgmr.msra.gmra.mxu3 %vm23_vm0, %v21_v4  ;;  %v205_v58 = vld [vmem:[%s314_s3] ss:$0 sm:$0xff]  ;;  %s180_s3 = sshll.u32 %s240_s2, 4  ;;  %s241_s30 = smov 128   ;;  %s181_s3 = int_to_ptr.vmem [resolvable:$true] %s180_s3 }
   0x6   :  { %v82_v10 = vand.u32 127, %v81_v9  ;;  %s242_s5 = smov 8  }
   0x8   :  { %vm83_vm1 = vcmp.lt.s32.totalorder %v82_v10, 32 }
  0x80   :  { %v53_v5 = vpop.f32.mrf.mxu0 }
  0x81   :  { %65 = vadd.xlane.f32.xlu0 %v53_v5 }
  0x82   :  { %v56_v7 = vpop.f32.mrf.mxu1 }
  0x86   :  { %v59_v6 = vpop.f32.mrf.mxu2 }
  0x87   :  { %69 = vadd.xlane.f32.xlu1 %v59_v6 }
  0x88   :  { %v62_v8 = vpop.f32.mrf.mxu3 }
  0x89   :  { %67 = vadd.xlane.f32.xlu0 %v56_v7 }
  0x8f   :  { %71 = vadd.xlane.f32.xlu1 %v62_v8 }
  0xf4   :  { %v66_v11 = vpop.xlane.xlu0 %65 }
  0xf5   :  { %v73_v12 = vmul.f32 0.03125, %v66_v11 }
  0xf7   :  { %v77_v13 = vsub.f32 %v53_v5, %v73_v12 }
  0xf9   :  { %v84_v14 = vsel %vm83_vm1, %v77_v13, 0.0 }
  0xfa   :  { %v70_v15 = vpop.xlane.xlu1 %69  ;;  %v88_v16 = vmul.f32 %v84_v14, %v84_v14 }
  0xfb   :  { %v75_v17 = vmul.f32 0.03125, %v70_v15 }
  0xfc   :  { %92 = vadd.xlane.f32.xlu2 %v88_v16  ;;  %v68_v18 = vpop.xlane.xlu0 %67 }
  0xfd   :  { %v79_v19 = vsub.f32 %v59_v6, %v75_v17  ;;  %v74_v20 = vmul.f32 0.03125, %v68_v18 }
  0xff   :  { %v78_v21 = vsub.f32 %v56_v7, %v74_v20  ;;  %v285_v22 = vsel %vm83_vm1, %v79_v19, 0.0 }
 0x100   :  { %v90_v23 = vmul.f32 %v285_v22, %v285_v22 }
 0x101   :  { %v290_v24 = vsel %vm83_vm1, %v78_v21, 0.0 }
 0x102   :  { %v72_v25 = vpop.xlane.xlu1 %71  ;;  %96 = vadd.xlane.f32.xlu0 %v90_v23  ;;  %v89_v26 = vmul.f32 %v290_v24, %v290_v24 }
 0x103   :  { %v76_v27 = vmul.f32 0.03125, %v72_v25 }
 0x104   :  { %94 = vadd.xlane.f32.xlu2 %v89_v26 }
 0x105   :  { %v80_v28 = vsub.f32 %v62_v8, %v76_v27 }
 0x107   :  { %v295_v29 = vsel %vm83_vm1, %v80_v28, 0.0 }
 0x108   :  { %v91_v30 = vmul.f32 %v295_v29, %v295_v29 }
 0x10a   :  { %98 = vadd.xlane.f32.xlu1 %v91_v30 }
 0x16f   :  { %v93_v31 = vpop.xlane.xlu2 %92 }
 0x170   :  { %v100_v32 = vmul.f32 0.03125, %v93_v31 }
 0x172   :  { %v104_v33 = vadd.f32 1e-05, %v100_v32 }
 0x174   :  { %206 = vrsqrt.f32 %v104_v33  ;;  %vm114_vm3 = vweird.f32 %v104_v33 }
 0x175   :  { %v97_v34 = vpop.xlane.xlu0 %96 }
 0x176   :  { %v102_v35 = vmul.f32 0.03125, %v97_v34 }
 0x177   :  { %v95_v36 = vpop.xlane.xlu2 %94 }
 0x178   :  { %v106_v37 = vadd.f32 1e-05, %v102_v35  ;;  %v101_v38 = vmul.f32 0.03125, %v95_v36 }
 0x17a   :  { %v207_v39 = vpop.eup %206  ;;  %208 = vrsqrt.f32 %v106_v37  ;;  %v105_v40 = vadd.f32 1e-05, %v101_v38  ;;  %vm134_vm6 = vweird.f32 %v106_v37 }
 0x17b   :  { %v109_v41 = vmul.f32 %v207_v39, %v104_v33  ;;  %vm115_vm2 = vweird.f32 %v207_v39 }
 0x17c   :  { %210 = vrsqrt.f32 %v105_v40  ;;  %vm116_vm4 = vmor %vm114_vm3, %vm115_vm2  ;;  %vm124_vm9 = vweird.f32 %v105_v40 }
 0x17d   :  { %v110_v42 = vmul.f32 %v207_v39, %v109_v41  ;;  %v99_v43 = vpop.xlane.xlu1 %98 }
 0x17e   :  { %v103_v44 = vmul.f32 0.03125, %v99_v43 }
 0x17f   :  { %v111_v45 = vmul.f32 0.5, %v110_v42 }
 0x180   :  { %v209_v46 = vpop.eup %208  ;;  %v107_v47 = vadd.f32 1e-05, %v103_v44 }
 0x181   :  { %v112_v48 = vsub.f32 1.5, %v111_v45  ;;  %v129_v49 = vmul.f32 %v209_v46, %v106_v37  ;;  %vm135_vm5 = vweird.f32 %v209_v46 }
 0x182   :  { %v211_v50 = vpop.eup %210  ;;  %212 = vrsqrt.f32 %v107_v47  ;;  %vm136_vm8 = vmor %vm134_vm6, %vm135_vm5  ;;  %vm144_vm12 = vweird.f32 %v107_v47 }
 0x183   :  { %v113_v51 = vmul.f32 %v207_v39, %v112_v48  ;;  %v130_v52 = vmul.f32 %v209_v46, %v129_v49  ;;  %v119_v53 = vmul.f32 %v211_v50, %v105_v40  ;;  %vm125_vm7 = vweird.f32 %v211_v50 }
 0x184   :  { %vm126_vm10 = vmor %vm124_vm9, %vm125_vm7 }
 0x185   :  { %v117_v55 = vsel %vm116_vm4, %v207_v39, %v113_v51  ;;  %v131_v56 = vmul.f32 0.5, %v130_v52  ;;  %v120_v57 = vmul.f32 %v211_v50, %v119_v53 }
 0x186   :  { %v148_v59 = vmul.f32 %v117_v55, %v84_v14 }
 0x187   :  { %v132_v60 = vsub.f32 1.5, %v131_v56  ;;  %v121_v61 = vmul.f32 0.5, %v120_v57 }
 0x188   :  { %v213_v62 = vpop.eup %212  ;;  %v156_v63 = vmul.f32 %v204_v54, %v148_v59 }
 0x189   :  { %v133_v0 = vmul.f32 %v209_v46, %v132_v60  ;;  %v122_v1 = vsub.f32 1.5, %v121_v61  ;;  %v139_v2 = vmul.f32 %v213_v62, %v107_v47  ;;  %vm145_vm11 = vweird.f32 %v213_v62 }
 0x18a   :  { %v164_v3 = vadd.f32 %v205_v58, %v156_v63  ;;  %vm146_vm13 = vmor %vm144_vm12, %vm145_vm11 }
 0x18b   :  { %v137_v4 = vsel %vm136_vm8, %v209_v46, %v133_v0  ;;  %v123_v5 = vmul.f32 %v211_v50, %v122_v1  ;;  %v140_v6 = vmul.f32 %v213_v62, %v139_v2 }
 0x18c   :  { %v168_v7 = vmax.f32 %v164_v3, 0.0  ;;  %v150_v8 = vmul.f32 %v137_v4, %v285_v22 }
 0x18d   :  { %v127_v9 = vsel %vm126_vm10, %v211_v50, %v123_v5  ;;  %v141_v10 = vmul.f32 0.5, %v140_v6 }
 0x18e   :  { %172 = vst [vmem:[#allocation2] sm:$0xff] %v168_v7  ;;  %v158_v11 = vmul.f32 %v204_v54, %v150_v8  ;;  %v149_v12 = vmul.f32 %v127_v9, %v290_v24 }
 0x18f   :  { %v142_v13 = vsub.f32 1.5, %v141_v10 }
 0x190   :  { %v166_v14 = vadd.f32 %v205_v58, %v158_v11  ;;  %v157_v15 = vmul.f32 %v204_v54, %v149_v12 }
 0x191   :  { %v143_v16 = vmul.f32 %v213_v62, %v142_v13 }
 0x192   :  { %v170_v17 = vmax.f32 %v166_v14, 0.0  ;;  %v165_v18 = vadd.f32 %v205_v58, %v157_v15 }
 0x193   :  { %v147_v19 = vsel %vm146_vm13, %v213_v62, %v143_v16 }
 0x194   :  { %174 = vst [vmem:[#allocation2 + $0x10] sm:$0xff] %v170_v17  ;;  %v169_v20 = vmax.f32 %v165_v18, 0.0  ;;  %v151_v21 = vmul.f32 %v147_v19, %v295_v29 }
 0x196   :  { %173 = vst [vmem:[#allocation2 + $0x8] sm:$0xff] %v169_v20  ;;  %v159_v22 = vmul.f32 %v204_v54, %v151_v21 }
 0x198   :  { %v167_v23 = vadd.f32 %v205_v58, %v159_v22 }
 0x19a   :  { %v171_v24 = vmax.f32 %v167_v23, 0.0 }
 0x19c   :  { %175 = vst [vmem:[#allocation2 + $0x18] sm:$0xff] %v171_v24 }
 0x19d   :  { %188 = dma.vmem_to_hbm [thread:$0]  %s181_s3, 512, %s183_s29, [#allocation3], %s241_s30, %s241_s30, %s242_s5  }
 0x19e   :  { %238 = dma.done.wait [#allocation3], 512  }
 0x19f   :  { %239 = vsyncadd [#allocation3], 4294966784 }
 0x1a0   :  { %193 = vsyncpa [#allocation3], 1 }

</bundles_post_ra>
